<compile_context>
chip_gen: v5e
topology: v5e:2x2
jax: 0.10.0
libtpu: 0.0.40
codegen_flags: <defaults>
</compile_context>

<pallas_src>
import math

import jax
import jax.numpy as jnp
from jax.experimental import pallas as pl
from jax.experimental.pallas import tpu as pltpu

d_k = d_v = 64


def _sdpa_kernel(q_ref, k_ref, v_ref, mask_ref, ctx_ref, attn_ref):
    # Block shapes:
    #   q_ref    : (G, TQ, D)
    #   k_ref    : (G, S,  D)
    #   v_ref    : (G, S,  D)
    #   mask_ref : (G, TQ, S)  int8, nonzero == masked
    #   ctx_ref  : (G, TQ, D)
    #   attn_ref : (G, TQ, S)
    scale = jnp.float32(1.0 / math.sqrt(d_k))

    # Fold the softmax scale into q (TQ*D multiplies instead of TQ*S).
    q = q_ref[...] * scale
    k = k_ref[...]
    v = v_ref[...]
    mask = mask_ref[...]

    # scores[g, q, s] = sum_d q[g, q, d] * k[g, s, d]   (no K relayout)
    scores = jax.lax.dot_general(
        q, k,
        dimension_numbers=(((2,), (2,)), ((0,), (0,))),
        preferred_element_type=jnp.float32,
    )

    # masked_fill_(attn_mask, -1e9)
    scores = jnp.where(mask != 0, jnp.float32(-1000000000.0), scores)

    # Numerically stable softmax along the key axis (exact reciprocal to keep
    # 1e-4 parity with the f32 reference).
    m = jnp.max(scores, axis=-1, keepdims=True)
    e = jnp.exp(scores - m)
    denom = jnp.sum(e, axis=-1, keepdims=True)
    attn = e * pl.reciprocal(denom, approx=False)

    # context[g, q, d] = sum_s attn[g, q, s] * v[g, s, d]
    context = jax.lax.dot_general(
        attn, v,
        dimension_numbers=(((2,), (1,)), ((0,), (0,))),
        preferred_element_type=jnp.float32,
    )

    ctx_ref[...] = context.astype(ctx_ref.dtype)
    attn_ref[...] = attn.astype(attn_ref.dtype)


def _vmem_capacity_bytes():
    """Physical VMEM of the local generation; conservative fallback (v7x-sized)."""
    try:
        return int(pltpu.get_tpu_info().vmem_capacity_bytes)
    except Exception:
        return 64 * 1024 * 1024


def _working_set_bytes(G, TQ, S, D):
    """VMEM footprint per grid step.

    Blocks are double-buffered by the Pallas pipeline (factor 2); the in-kernel
    softmax temporaries (scores, e, attn-before-store) are ~3 extra (TQ, S) f32
    live values plus the scaled q copy, and are NOT double-buffered.
    """
    blk_q = 4 * TQ * D
    blk_kv = 4 * S * D
    blk_mask = 1 * TQ * S          # int8
    blk_ctx = 4 * TQ * D
    blk_attn = 4 * TQ * S
    blocks = 2 * G * (blk_q + 2 * blk_kv + blk_mask + blk_ctx + blk_attn)
    temps = G * (3 * 4 * TQ * S + blk_q)
    return blocks + temps


def _tq_candidates(S):
    """Query-tile candidates (descending).  Empty list => pad the query axis."""
    if S <= 512:
        return [S]
    return [c for c in (512, 384, 256, 128) if S % c == 0]


def _select_tiling(BH, Sq, S, D, budget_bytes, tq_cands):
    """Pick (TQ, G).

    Priority: keep TQ large (D=64 underfills the 256-wide MXU on v6e/v7x) and
    shrink G (heads per step) first; among fitting G, prefer one that keeps the
    total parallel grid even so v7x's two TensorCores stay balanced, then the
    largest G (fewest grid steps → less per-step overhead).
    """
    g_cands = sorted((g for g in range(1, BH + 1) if BH % g == 0), reverse=True)
    for TQ in tq_cands:
        fits = [g for g in g_cands
                if _working_set_bytes(g, TQ, S, D) <= budget_bytes]
        if not fits:
            continue
        n_q = Sq // TQ
        balanced = [g for g in fits
                    if ((BH // g) * n_q) % 2 == 0 or (BH // g) * n_q == 1]
        return TQ, (balanced[0] if balanced else fits[0])
    # Nothing fits the budget: smallest tile, one head-slice per step; the
    # compiler may spill but still produces a correct kernel.
    return tq_cands[-1], 1


def scaled_dot_product_attention(Q, K, V, attn_mask):
    """Q, K, V: [B, H, S, D] float32; attn_mask: [B, H, S, S] bool (True == masked)."""
    B, H, S, D = Q.shape
    BH = B * H

    q = Q.reshape(BH, S, D)
    k = K.reshape(BH, S, D)
    v = V.reshape(BH, S, D)
    # int8 mask: 4x less DMA traffic than int32 on the O(S^2) read.
    mask = attn_mask.reshape(BH, S, S).astype(jnp.int8)

    # Avoid the tiny-tile cliff for awkward sequence lengths: pad the *query*
    # axis to a multiple of 128 (keys are untouched, so the softmax of every
    # real row is unchanged), and slice the padding off afterwards.
    tq_cands = _tq_candidates(S)
    Sq = S
    if not tq_cands:
        Sq = pl.cdiv(S, 128) * 128
        pad = Sq - S
        q = jnp.pad(q, ((0, 0), (0, pad), (0, 0)))
        mask = jnp.pad(mask, ((0, 0), (0, pad), (0, 0)))
        tq_cands = [c for c in (512, 384, 256, 128) if Sq % c == 0]

    # Generation-aware VMEM budgeting.
    capacity = _vmem_capacity_bytes()
    budget = int(capacity * 0.6)            # ≈38 MiB on v7x, ≈77 MiB on v5e/v6e

    TQ, G = _select_tiling(BH, Sq, S, D, budget, tq_cands)
    grid = (BH // G, Sq // TQ)

    q_spec = pl.BlockSpec((G, TQ, D), lambda i, j: (i, j, 0))
    kv_spec = pl.BlockSpec((G, S, D), lambda i, j: (i, 0, 0))
    mask_spec = pl.BlockSpec((G, TQ, S), lambda i, j: (i, j, 0))
    ctx_spec = pl.BlockSpec((G, TQ, D), lambda i, j: (i, j, 0))
    attn_spec = pl.BlockSpec((G, TQ, S), lambda i, j: (i, j, 0))

    working_set = _working_set_bytes(G, TQ, S, D)
    vmem_limit = int(min(max(working_set + (8 << 20), 32 << 20),
                         int(capacity * 0.75)))

    ctx, attn = pl.pallas_call(
        _sdpa_kernel,
        out_shape=(
            jax.ShapeDtypeStruct((BH, Sq, D), jnp.float32),
            jax.ShapeDtypeStruct((BH, Sq, S), jnp.float32),
        ),
        grid_spec=pltpu.PrefetchScalarGridSpec(
            num_scalar_prefetch=0,
            grid=grid,
            in_specs=[q_spec, kv_spec, kv_spec, mask_spec],
            out_specs=[ctx_spec, attn_spec],
        ),
        compiler_params=pltpu.CompilerParams(
            dimension_semantics=("parallel", "parallel"),
            vmem_limit_bytes=vmem_limit,
        ),
    )(q, k, v, mask)

    if Sq != S:
        ctx = ctx[:, :S]
        attn = attn[:, :S]
    return ctx.reshape(B, H, S, D), attn.reshape(B, H, S, S)


def _reference(Q, K, V, attn_mask):
    scores = jnp.einsum("bhqd,bhkd->bhqk", Q, K) / math.sqrt(d_k)
    scores = jnp.where(attn_mask, -1000000000.0, scores)
    attn = jax.nn.softmax(scores, axis=-1)
    context = jnp.einsum("bhqk,bhkd->bhqd", attn, V)
    return context, attn


if __name__ == "__main__":
    B, H, S, D = 2, 2, 8, d_k  # small shapes; D fixed by the module (d_k = 64)

    key = jax.random.PRNGKey(0)
    kq, kk, kv = jax.random.split(key, 3)
    Q = jax.random.normal(kq, (B, H, S, D), dtype=jnp.float32)
    K = jax.random.normal(kk, (B, H, S, D), dtype=jnp.float32)
    V = jax.random.normal(kv, (B, H, S, D), dtype=jnp.float32)

    # Typical padding-style mask: mask out the last 2 key positions (True == masked).
    attn_mask = jnp.zeros((B, H, S, S), dtype=jnp.bool_).at[..., -2:].set(True)

    ctx, attn = scaled_dot_product_attention(Q, K, V, attn_mask)
    jax.block_until_ready((ctx, attn))

    ctx_ref, attn_ref = _reference(Q, K, V, attn_mask)
    assert jnp.allclose(ctx, ctx_ref, atol=1e-4, rtol=1e-4)
    assert jnp.allclose(attn, attn_ref, atol=1e-4, rtol=1e-4)

    print("KERNEL_OK")
</pallas_src>

<mosaic_0001>
module attributes {stable_mosaic.version = 11 : i64} {
  func.func @_sdpa_kernel(%arg0: i32, %arg1: i32, %arg2: memref<4x8x64xf32, #tpu.memory_space<vmem>>, %arg3: memref<4x8x64xf32, #tpu.memory_space<vmem>>, %arg4: memref<4x8x64xf32, #tpu.memory_space<vmem>>, %arg5: memref<4x8x8xi8, #tpu.memory_space<vmem>>, %arg6: memref<4x8x64xf32, #tpu.memory_space<vmem>>, %arg7: memref<4x8x8xf32, #tpu.memory_space<vmem>>) attributes {dimension_semantics = [#tpu.dimension_semantics<parallel>, #tpu.dimension_semantics<parallel>], iteration_bounds = array<i64: 1, 1>, scalar_prefetch = 0 : i64, scratch_operands = 0 : i64, tpu.core_type = #tpu.core_type<tc>, window_params = [{transform_indices = @transform_0, window_bounds = array<i64: 4, 8, 64>}, {transform_indices = @transform_1, window_bounds = array<i64: 4, 8, 64>}, {transform_indices = @transform_2, window_bounds = array<i64: 4, 8, 64>}, {transform_indices = @transform_3, window_bounds = array<i64: 4, 8, 8>}, {transform_indices = @transform_4, window_bounds = array<i64: 4, 8, 64>}, {transform_indices = @transform_5, window_bounds = array<i64: 4, 8, 8>}]} {
    %c0 = arith.constant 0 : index
    %c0_0 = arith.constant 0 : index
    %c0_1 = arith.constant 0 : index
    %0 = vector.load %arg2[%c0, %c0_0, %c0_1] : memref<4x8x64xf32, #tpu.memory_space<vmem>>, vector<4x8x64xf32>
    %cst = arith.constant 1.250000e-01 : f32
    %1 = vector.broadcast %cst : f32 to vector<4x8x64xf32>
    %2 = arith.mulf %0, %1 : vector<4x8x64xf32>
    %c0_2 = arith.constant 0 : index
    %c0_3 = arith.constant 0 : index
    %c0_4 = arith.constant 0 : index
    %3 = vector.load %arg3[%c0_2, %c0_3, %c0_4] : memref<4x8x64xf32, #tpu.memory_space<vmem>>, vector<4x8x64xf32>
    %c0_5 = arith.constant 0 : index
    %c0_6 = arith.constant 0 : index
    %c0_7 = arith.constant 0 : index
    %4 = vector.load %arg4[%c0_5, %c0_6, %c0_7] : memref<4x8x64xf32, #tpu.memory_space<vmem>>, vector<4x8x64xf32>
    %c0_8 = arith.constant 0 : index
    %c0_9 = arith.constant 0 : index
    %c0_10 = arith.constant 0 : index
    %5 = vector.load %arg5[%c0_8, %c0_9, %c0_10] : memref<4x8x8xi8, #tpu.memory_space<vmem>>, vector<4x8x8xi8>
    %cst_11 = arith.constant dense<0.000000e+00> : vector<4x8x8xf32>
    %6 = tpu.matmul %2, %3, %cst_11 {dimension_numbers = #tpu.dot_dimension_numbers<[2], [2], [1], [1], [0, 0, 0, 1, 1, 1], [0], [0]>} : vector<4x8x64xf32>, vector<4x8x64xf32>, vector<4x8x8xf32> -> vector<4x8x8xf32>
    %c0_i8 = arith.constant 0 : i8
    %7 = vector.broadcast %c0_i8 : i8 to vector<4x8x8xi8>
    %8 = arith.cmpi ne, %5, %7 : vector<4x8x8xi8>
    %cst_12 = arith.constant -1.000000e+09 : f32
    %9 = vector.broadcast %cst_12 : f32 to vector<4x8x8xf32>
    %10 = arith.select %8, %9, %6 : vector<4x8x8xi1>, vector<4x8x8xf32>
    %cst_13 = arith.constant dense<0xFF800000> : vector<4x8xf32>
    %11 = vector.multi_reduction <maximumf>, %10, %cst_13 [2] : vector<4x8x8xf32> to vector<4x8xf32>
    %12 = vector.shape_cast %11 : vector<4x8xf32> to vector<4x8x1xf32>
    %13 = vector.broadcast %12 : vector<4x8x1xf32> to vector<4x8x8xf32>
    %14 = arith.subf %10, %13 : vector<4x8x8xf32>
    %15 = math.exp %14 : vector<4x8x8xf32>
    %cst_14 = arith.constant dense<0.000000e+00> : vector<4x8xf32>
    %16 = vector.multi_reduction <add>, %15, %cst_14 [2] : vector<4x8x8xf32> to vector<4x8xf32>
    %17 = vector.shape_cast %16 : vector<4x8xf32> to vector<4x8x1xf32>
    %18 = tpu.reciprocal %17 : vector<4x8x1xf32> -> vector<4x8x1xf32>
    %19 = vector.broadcast %18 : vector<4x8x1xf32> to vector<4x8x8xf32>
    %20 = arith.mulf %15, %19 : vector<4x8x8xf32>
    %cst_15 = arith.constant dense<0.000000e+00> : vector<4x8x64xf32>
    %21 = tpu.matmul %20, %4, %cst_15 {dimension_numbers = #tpu.dot_dimension_numbers<[2], [1], [1], [2], [0, 0, 0, 1, 1, 2], [0], [0]>} : vector<4x8x8xf32>, vector<4x8x64xf32>, vector<4x8x64xf32> -> vector<4x8x64xf32>
    %c0_16 = arith.constant 0 : index
    %c0_17 = arith.constant 0 : index
    %c0_18 = arith.constant 0 : index
    %22 = vector.load %arg6[%c0_16, %c0_17, %c0_18] : memref<4x8x64xf32, #tpu.memory_space<vmem>>, vector<4x8x64xf32>
    tpu.vector_store %arg6[%c0_16, %c0_17, %c0_18], %21 {strides = array<i32>} : memref<4x8x64xf32, #tpu.memory_space<vmem>>, vector<4x8x64xf32>,
    %c0_19 = arith.constant 0 : index
    %c0_20 = arith.constant 0 : index
    %c0_21 = arith.constant 0 : index
    %23 = vector.load %arg7[%c0_19, %c0_20, %c0_21] : memref<4x8x8xf32, #tpu.memory_space<vmem>>, vector<4x8x8xf32>
    tpu.vector_store %arg7[%c0_19, %c0_20, %c0_21], %20 {strides = array<i32>} : memref<4x8x8xf32, #tpu.memory_space<vmem>>, vector<4x8x8xf32>,
    return
  }
  func.func @transform_0(%arg0: i32, %arg1: i32) -> (i32, i32, i32) {
    %c0_i32 = arith.constant 0 : i32
    %c0_i32_0 = arith.constant 0 : i32
    return %arg0, %arg1, %c0_i32 : i32, i32, i32
  }
  func.func @transform_1(%arg0: i32, %arg1: i32) -> (i32, i32, i32) {
    %c0_i32 = arith.constant 0 : i32
    %c0_i32_0 = arith.constant 0 : i32
    %c0_i32_1 = arith.constant 0 : i32
    return %arg0, %c0_i32, %c0_i32_0 : i32, i32, i32
  }
  func.func @transform_2(%arg0: i32, %arg1: i32) -> (i32, i32, i32) {
    %c0_i32 = arith.constant 0 : i32
    %c0_i32_0 = arith.constant 0 : i32
    %c0_i32_1 = arith.constant 0 : i32
    return %arg0, %c0_i32, %c0_i32_0 : i32, i32, i32
  }
  func.func @transform_3(%arg0: i32, %arg1: i32) -> (i32, i32, i32) {
    %c0_i32 = arith.constant 0 : i32
    %c0_i32_0 = arith.constant 0 : i32
    return %arg0, %arg1, %c0_i32 : i32, i32, i32
  }
  func.func @transform_4(%arg0: i32, %arg1: i32) -> (i32, i32, i32) {
    %c0_i32 = arith.constant 0 : i32
    %c0_i32_0 = arith.constant 0 : i32
    return %arg0, %arg1, %c0_i32 : i32, i32, i32
  }
  func.func @transform_5(%arg0: i32, %arg1: i32) -> (i32, i32, i32) {
    %c0_i32 = arith.constant 0 : i32
    %c0_i32_0 = arith.constant 0 : i32
    return %arg0, %arg1, %c0_i32 : i32, i32, i32
  }
}

</mosaic_0001>

<bundles_post_ra>
// kernel: tpu_custom_call.1
= control target key start
LH: loop header
LB: loop body
LE: loop exit
PB: predicated region body
PF: predicated region fallthrough
CT: control target
= control target key end

     0   :  { %11 = vsyncpa [#allocation3], 0  ;;  %s774_s0 = inlined_call_operand.hbm [shape: f32[4,8,64], index: 0, kind: input, shape index: {}]   ;;  %s775_s1 = inlined_call_operand.hbm [shape: f32[4,8,64], index: 1, kind: input, shape index: {}]   ;;  %s776_s2 = inlined_call_operand.hbm [shape: f32[4,8,64], index: 2, kind: input, shape index: {}]   ;;  %s777_s3 = inlined_call_operand.hbm [shape: s8[4,8,8], index: 3, kind: input, shape index: {}]   ;;  %s778_s4 = inlined_call_operand.hbm [shape: f32[4,8,64], index: 4, kind: output, shape index: {0}]   ;;  %s779_s5 = inlined_call_operand.hbm [shape: f32[4,8,8], index: 5, kind: output, shape index: {1}]  }
   0x1   :  { %12 = vsyncpa [#allocation6], 0 }
   0x2   :  { %13 = vsyncpa [#allocation9], 0 }
   0x3   :  { %14 = vsyncpa [#allocation4], 0 }
   0x4   :  { %15 = vsyncpa [#allocation12], 0  ;;  %s33_s20 = sshll.u32 %s775_s1, 4  ;;  %s660_s21 = smov [#allocation5]   ;;  %s34_s20 = int_to_ptr.hbm [resolvable:$true] %s33_s20 }
   0x5   :  { %s35_s22 = sshll.u32 %s660_s21, 4  ;;  %s20_s25 = sshll.u32 %s774_s0, 4  ;;  %s36_s22 = int_to_ptr.vmem [resolvable:$true] %s35_s22  ;;  %s21_s25 = int_to_ptr.hbm [resolvable:$true] %s20_s25 }
   0x6   :  { %s661_s26 = smov 128   ;;  %s662_s27 = smov 8  }
   0x7   :  { %41 = dma.hbm_to_vmem [thread:$0]  %s34_s20, 512, %s36_s22, [#allocation6], %s661_s26, %s661_s26, %s662_s27  }
   0x8   :  { %s663_s28 = smov [#allocation2]   ;;  %s46_s1 = sshll.u32 %s776_s2, 4  ;;  %s47_s1 = int_to_ptr.hbm [resolvable:$true] %s46_s1 }
   0x9   :  { %s22_s29 = sshll.u32 %s663_s28, 4  ;;  %s59_s8 = sshll.u32 %s777_s3, 4  ;;  %s23_s29 = int_to_ptr.vmem [resolvable:$true] %s22_s29  ;;  %s60_s8 = int_to_ptr.hbm [resolvable:$true] %s59_s8 }
   0xa   :  { %28 = dma.hbm_to_vmem [thread:$0]  %s21_s25, 512, %s23_s29, [#allocation3], %s661_s26, %s661_s26, %s662_s27  }
   0xb   :  { %s664_s9 = smov [#allocation7]   ;;  %s665_s11 = smov [#allocation8]  }
   0xc   :  { %s48_s10 = sshll.u32 %s664_s9, 4  ;;  %s61_s2 = sshll.u32 %s665_s11, 4  ;;  %s49_s10 = int_to_ptr.vmem [resolvable:$true] %s48_s10  ;;  %s62_s2 = int_to_ptr.vmem [resolvable:$true] %s61_s2 }
   0xd   :  { %54 = dma.hbm_to_vmem [thread:$0]  %s47_s1, 512, %s49_s10, [#allocation6], %s661_s26, %s661_s26, %s662_s27  }
   0xe   :  { %s666_s12 = smov 32   ;;  %s667_s13 = smov 2  }
   0xf   :  { %67 = dma.hbm_to_vmem [thread:$0]  %s60_s8, 128, %s62_s2, [#allocation9], %s666_s12, %s666_s12, %s667_s13  }
  0x10   :  { %650 = dma.done.wait [#allocation3], 512  }
  0x11   :  { %651 = vsyncadd [#allocation3], 4294966784 }
  0x12   :  { %652 = dma.done.wait [#allocation6], 1024  }
  0x13   :  { %653 = vsyncadd [#allocation6], 4294966272 }
  0x14   :  { %654 = dma.done.wait [#allocation9], 128  }
  0x15   :  { %655 = vsyncadd [#allocation9], 4294967168  ;;  %vm106_vm0 = vcmask 523264   ;;  %v94_v0 = vld [vmem:[#allocation5] sm:$0xff]  ;;  %v96_v1 = vld [vmem:[#allocation5 + $0x10] sm:$0xff]  ;;  %v668_v14 = vmov 0  }
  0x16   :  { %v86_v2 = vld [vmem:[#allocation2] sm:$0xff]  ;;  %467 = vmatpush.xpose.msk.msra.mxu0 %vm106_vm0, %v94_v0  ;;  %471 = vmatpush.xpose.msk.msra.mxu2 %vm106_vm0, %v96_v1  ;;  %v88_v4 = vld [vmem:[#allocation2 + $0x10] sm:$0xff]  ;;  %v95_v5 = vld [vmem:[#allocation5 + $0x8] sm:$0xff]  ;;  %vm231_vm6 = vcmask 64512   ;;  %s669_s3 = smov [#allocation11]   ;;  %s447_s17 = sshll.u32 %s779_s5, 4  ;;  %s448_s17 = int_to_ptr.hbm [resolvable:$true] %s447_s17 }
  0x17   :  { %v90_v3 = vmul.f32 0.125, %v86_v2  ;;  %v97_v6 = vld [vmem:[#allocation5 + $0x18] sm:$0xff]  ;;  %v92_v7 = vmul.f32 0.125, %v88_v4  ;;  %469 = vmatpush.xpose.msk.msra.mxu1 %vm106_vm0, %v95_v5  ;;  %v87_v8 = vld [vmem:[#allocation2 + $0x8] sm:$0xff]  ;;  %v102_v12 = vld [vmem:[#allocation8] sm:$0x3] }
  0x18   :  { %473 = vmatpush.xpose.msk.msra.mxu3 %vm106_vm0, %v97_v6  ;;  %v89_v9 = vld [vmem:[#allocation2 + $0x18] sm:$0xff]  ;;  %v91_v10 = vmul.f32 0.125, %v87_v8  ;;  %vm211_vm1 = vnez %v102_v12  ;;  %v103_v13 = vld [vmem:[#allocation8 + $0x2] sm:$0x3]  ;;  %v104_v16 = vld [vmem:[#allocation8 + $0x4] sm:$0x3] }
  0x19   :  { %v93_v11 = vmul.f32 0.125, %v89_v9  ;;  %468 = vmatmul.msk.f32.vlgmr.msra.gmra.mxu0 %vm106_vm0, %v90_v3  ;;  %472 = vmatmul.msk.f32.vlgmr.msra.gmra.mxu2 %vm106_vm0, %v92_v7  ;;  %v215_v15 = vsel %vm211_vm1, 16843009, %v668_v14  ;;  %vm212_vm2 = vnez %v103_v13  ;;  %vm213_vm3 = vnez %v104_v16  ;;  %v105_v19 = vld [vmem:[#allocation8 + $0x6] sm:$0x3]  ;;  %v100_v58 = vld [vmem:[#allocation7 + $0x10] sm:$0xff] }
  0x1a   :  { %470 = vmatmul.msk.f32.vlgmr.msra.gmra.mxu1 %vm106_vm0, %v91_v10  ;;  %v219_v17 = vunpack.c.0.s8 %v215_v15  ;;  %v216_v18 = vsel %vm212_vm2, 16843009, %v668_v14  ;;  %v217_v20 = vsel %vm213_vm3, 16843009, %v668_v14  ;;  %vm214_vm5 = vnez %v105_v19  ;;  %v98_v57 = vld [vmem:[#allocation7] sm:$0xff]  ;;  %392 = vmatpush.msrb.mxu2 %v100_v58  ;;  %v99_v59 = vld [vmem:[#allocation7 + $0x8] sm:$0xff] }
  0x1b   :  { %474 = vmatmul.msk.f32.vlgmr.msra.gmra.mxu3 %vm106_vm0, %v93_v11  ;;  %v220_v21 = vunpack.c.0.s8 %v216_v18  ;;  %v221_v23 = vunpack.c.0.s8 %v217_v20  ;;  %v218_v25 = vsel %vm214_vm5, 16843009, %v668_v14  ;;  %346 = vmatpush.msrb.mxu0 %v98_v57  ;;  %v101_v60 = vld [vmem:[#allocation7 + $0x18] sm:$0xff]  ;;  %s445_s14 = sshll.u32 %s669_s3, 4  ;;  %s670_s18 = smov [#allocation10]   ;;  %s446_s14 = int_to_ptr.vmem [resolvable:$true] %s445_s14 }
  0x1c   :  { %vm223_vm4 = vcmp.ne.s32.totalorder %v219_v17, 0  ;;  %v222_v28 = vunpack.c.0.s8 %v218_v25  ;;  %369 = vmatpush.msrb.mxu1 %v99_v59  ;;  %415 = vmatpush.msrb.mxu3 %v101_v60  ;;  %s432_s19 = sshll.u32 %s670_s18, 4  ;;  %s434_s5 = sshll.u32 %s778_s4, 4  ;;  %s433_s19 = int_to_ptr.vmem [resolvable:$true] %s432_s19  ;;  %s435_s5 = int_to_ptr.hbm [resolvable:$true] %s434_s5 }
  0x1d   :  { %vm224_vm7 = vcmp.ne.s32.totalorder %v220_v21, 0  ;;  %vm225_vm8 = vcmp.ne.s32.totalorder %v221_v23, 0 }
  0x1e   :  { %vm226_vm9 = vcmp.ne.s32.totalorder %v222_v28, 0 }
  0x96   :  { %v130_v22 = vpop.f32.mrf.mxu0 }
  0x97   :  { %v227_v24 = vsel %vm223_vm4, -1e+09, %v130_v22  ;;  %v156_v27 = vpop.f32.mrf.mxu1 }
  0x98   :  { %v232_v26 = vsel %vm231_vm6, %v227_v24, -inf  ;;  %v228_v29 = vsel %vm224_vm7, -1e+09, %v156_v27 }
  0x99   :  { %233 = vmax.xlane.f32.xlu1 %v232_v26  ;;  %v235_v33 = vsel %vm231_vm6, %v228_v29, -inf }
  0x9c   :  { %v182_v30 = vpop.f32.mrf.mxu2 }
  0x9d   :  { %v229_v31 = vsel %vm225_vm8, -1e+09, %v182_v30 }
  0x9e   :  { %v238_v32 = vsel %vm231_vm6, %v229_v31, -inf  ;;  %v208_v34 = vpop.f32.mrf.mxu3 }
  0x9f   :  { %239 = vmax.xlane.f32.xlu0 %v238_v32  ;;  %v230_v35 = vsel %vm226_vm9, -1e+09, %v208_v34 }
  0xa0   :  { %v241_v36 = vsel %vm231_vm6, %v230_v35, -inf }
  0xa1   :  { %236 = vmax.xlane.f32.xlu1 %v235_v33 }
  0xa7   :  { %242 = vmax.xlane.f32.xlu0 %v241_v36 }
 0x10c   :  { %v234_v37 = vpop.xlane.xlu1 %233 }
 0x10d   :  { %v244_v38 = vsub.f32 %v227_v24, %v234_v37 }
 0x10f   :  { %v248_v39 = vmul.f32 1.442695, %v244_v38 }
 0x111   :  { %490 = vpow2.f32 %v248_v39 }
 0x112   :  { %v240_v40 = vpop.xlane.xlu0 %239 }
 0x113   :  { %v246_v41 = vsub.f32 %v229_v31, %v240_v40 }
 0x114   :  { %v237_v42 = vpop.xlane.xlu1 %236 }
 0x115   :  { %v252_v43 = vmul.f32 1.442695, %v246_v41  ;;  %v245_v44 = vsub.f32 %v228_v29, %v237_v42 }
 0x117   :  { %v491_v45 = vpop.eup %490  ;;  %492 = vpow2.f32 %v252_v43  ;;  %v250_v46 = vmul.f32 1.442695, %v245_v44 }
 0x118   :  { %v256_v47 = vsel %vm231_vm6, %v491_v45, 0.0 }
 0x119   :  { %494 = vpow2.f32 %v250_v46  ;;  %257 = vadd.xlane.f32.xlu0 %v256_v47 }
 0x11a   :  { %v243_v48 = vpop.xlane.xlu0 %242 }
 0x11b   :  { %v247_v49 = vsub.f32 %v230_v35, %v243_v48 }
 0x11d   :  { %v735_v50 = vpop.eup %492  ;;  %v254_v51 = vmul.f32 1.442695, %v247_v49 }
 0x11e   :  { %v262_v52 = vsel %vm231_vm6, %v735_v50, 0.0 }
 0x11f   :  { %v739_v53 = vpop.eup %494  ;;  %496 = vpow2.f32 %v254_v51  ;;  %263 = vadd.xlane.f32.xlu2 %v262_v52 }
 0x120   :  { %v259_v54 = vsel %vm231_vm6, %v739_v53, 0.0 }
 0x121   :  { %260 = vadd.xlane.f32.xlu1 %v259_v54 }
 0x125   :  { %v743_v55 = vpop.eup %496 }
 0x126   :  { %v265_v56 = vsel %vm231_vm6, %v743_v55, 0.0 }
 0x127   :  { %266 = vadd.xlane.f32.xlu2 %v265_v56 }
 0x18c   :  { %v258_v61 = vpop.xlane.xlu0 %257 }
 0x18d   :  { %498 = vrcp.f32 %v258_v61  ;;  %v279_v3 = vand.u32 2147483648, %v258_v61  ;;  %v277_v5 = vand.u32 2147483647, %v258_v61  ;;  %vm273_vm11 = vweird.f32 %v258_v61 }
 0x18f   :  { %v280_v11 = vor.u32 1.1754944e-38, %v279_v3  ;;  %vm278_vm13 = vcmp.eq.f32.partialorder %v277_v5, 8.507059e+37 }
 0x192   :  { %v264_v62 = vpop.xlane.xlu2 %263 }
 0x193   :  { %v499_v63 = vpop.eup %498  ;;  %500 = vrcp.f32 %v264_v62  ;;  %v305_v15 = vand.u32 2147483647, %v264_v62  ;;  %v307_v16 = vand.u32 2147483648, %v264_v62  ;;  %vm301_vm15 = vweird.f32 %v264_v62 }
 0x194   :  { %v269_v0 = vmul.f32 %v499_v63, %v258_v61  ;;  %v261_v1 = vpop.xlane.xlu1 %260  ;;  %vm274_vm10 = vweird.f32 %v499_v63 }
 0x195   :  { %502 = vrcp.f32 %v261_v1  ;;  %vm275_vm12 = vmor %vm273_vm11, %vm274_vm10  ;;  %v293_v21 = vand.u32 2147483648, %v261_v1  ;;  %v291_v24 = vand.u32 2147483647, %v261_v1  ;;  %vm306_vm3 = vcmp.eq.f32.partialorder %v305_v15, 8.507059e+37 }
 0x196   :  { %v270_v2 = vsub.f32 1.0, %v269_v0  ;;  %v308_v26 = vor.u32 1.1754944e-38, %v307_v16  ;;  %vm287_vm4 = vweird.f32 %v261_v1 }
 0x197   :  { %v294_v30 = vor.u32 1.1754944e-38, %v293_v21  ;;  %vm292_vm7 = vcmp.eq.f32.partialorder %v291_v24, 8.507059e+37 }
 0x198   :  { %v271_v4 = vmul.f32 %v499_v63, %v270_v2 }
 0x199   :  { %v501_v6 = vpop.eup %500 }
 0x19a   :  { %v272_v7 = vadd.f32 %v499_v63, %v271_v4  ;;  %v297_v8 = vmul.f32 %v501_v6, %v264_v62  ;;  %v267_v9 = vpop.xlane.xlu2 %266  ;;  %vm302_vm14 = vweird.f32 %v501_v6 }
 0x19b   :  { %v503_v10 = vpop.eup %502  ;;  %504 = vrcp.f32 %v267_v9  ;;  %vm303_vm2 = vmor %vm301_vm15, %vm302_vm14  ;;  %v321_v35 = vand.u32 2147483648, %v267_v9  ;;  %v319_v38 = vand.u32 2147483647, %v267_v9  ;;  %vm315_vm9 = vweird.f32 %v267_v9 }
 0x19c   :  { %v276_v12 = vsel %vm275_vm12, %v499_v63, %v272_v7  ;;  %v298_v13 = vsub.f32 1.0, %v297_v8  ;;  %v283_v14 = vmul.f32 %v503_v10, %v261_v1  ;;  %vm288_vm1 = vweird.f32 %v503_v10 }
 0x19d   :  { %v281_v17 = vsel %vm278_vm13, %v280_v11, %v276_v12  ;;  %vm289_vm5 = vmor %vm287_vm4, %vm288_vm1  ;;  %v322_v41 = vor.u32 1.1754944e-38, %v321_v35  ;;  %vm320_vm11 = vcmp.eq.f32.partialorder %v319_v38, 8.507059e+37 }
 0x19e   :  { %v299_v18 = vmul.f32 %v501_v6, %v298_v13  ;;  %v284_v19 = vsub.f32 1.0, %v283_v14  ;;  %v324_v20 = vmul.f32 %v491_v45, %v281_v17 }
 0x1a0   :  { %v300_v22 = vadd.f32 %v501_v6, %v299_v18  ;;  %v285_v23 = vmul.f32 %v503_v10, %v284_v19  ;;  %475 = vmatmul.msk.f32.vlgmr.msrb.gmra.mxu0 %vm231_vm6, %v324_v20  ;;  %424 = vst.msk [vmem:[#allocation11] sm:$0xff] %vm231_vm6, %v324_v20 }
 0x1a1   :  { %v505_v25 = vpop.eup %504 }
 0x1a2   :  { %v286_v27 = vadd.f32 %v503_v10, %v285_v23  ;;  %v311_v28 = vmul.f32 %v505_v25, %v267_v9  ;;  %v304_v29 = vsel %vm303_vm2, %v501_v6, %v300_v22  ;;  %vm316_vm8 = vweird.f32 %v505_v25 }
 0x1a3   :  { %v309_v31 = vsel %vm306_vm3, %v308_v26, %v304_v29  ;;  %vm317_vm10 = vmor %vm315_vm9, %vm316_vm8 }
 0x1a4   :  { %v290_v32 = vsel %vm289_vm5, %v503_v10, %v286_v27  ;;  %v312_v33 = vsub.f32 1.0, %v311_v28  ;;  %v326_v34 = vmul.f32 %v735_v50, %v309_v31 }
 0x1a5   :  { %v295_v36 = vsel %vm292_vm7, %v294_v30, %v290_v32 }
 0x1a6   :  { %v313_v37 = vmul.f32 %v505_v25, %v312_v33  ;;  %477 = vmatmul.msk.f32.vlgmr.msrb.gmra.mxu2 %vm231_vm6, %v326_v34  ;;  %426 = vst.msk [vmem:[#allocation11 + $0x10] sm:$0xff] %vm231_vm6, %v326_v34  ;;  %v325_v39 = vmul.f32 %v739_v53, %v295_v36 }
 0x1a8   :  { %v314_v40 = vadd.f32 %v505_v25, %v313_v37  ;;  %476 = vmatmul.msk.f32.vlgmr.msrb.gmra.mxu1 %vm231_vm6, %v325_v39  ;;  %425 = vst.msk [vmem:[#allocation11 + $0x8] sm:$0xff] %vm231_vm6, %v325_v39 }
 0x1aa   :  { %v318_v42 = vsel %vm317_vm10, %v505_v25, %v314_v40 }
 0x1ab   :  { %v323_v43 = vsel %vm320_vm11, %v322_v41, %v318_v42 }
 0x1ac   :  { %v327_v44 = vmul.f32 %v743_v55, %v323_v43 }
 0x1ae   :  { %478 = vmatmul.msk.f32.vlgmr.msrb.gmra.mxu3 %vm231_vm6, %v327_v44  ;;  %427 = vst.msk [vmem:[#allocation11 + $0x18] sm:$0xff] %vm231_vm6, %v327_v44 }
 0x1af   :  { %453 = dma.vmem_to_hbm [thread:$0]  %s446_s14, 512, %s448_s17, [#allocation12], %s661_s26, %s661_s26, %s662_s27  }
 0x21d   :  { %v348_v45 = vpop.f32.mrf.mxu0 }
 0x21e   :  { %420 = vst.msk [vmem:[#allocation10] sm:$0xff] %vm106_vm0, %v348_v45 }
 0x225   :  { %v371_v46 = vpop.f32.mrf.mxu1 }
 0x226   :  { %421 = vst.msk [vmem:[#allocation10 + $0x8] sm:$0xff] %vm106_vm0, %v371_v46 }
 0x229   :  { %v394_v47 = vpop.f32.mrf.mxu2 }
 0x22a   :  { %422 = vst.msk [vmem:[#allocation10 + $0x10] sm:$0xff] %vm106_vm0, %v394_v47 }
 0x231   :  { %v417_v48 = vpop.f32.mrf.mxu3 }
 0x232   :  { %423 = vst.msk [vmem:[#allocation10 + $0x18] sm:$0xff] %vm106_vm0, %v417_v48 }
 0x233   :  { %440 = dma.vmem_to_hbm [thread:$0]  %s433_s19, 512, %s435_s5, [#allocation4], %s661_s26, %s661_s26, %s662_s27  }
 0x234   :  { %656 = dma.done.wait [#allocation4], 512  }
 0x235   :  { %657 = vsyncadd [#allocation4], 4294966784 }
 0x236   :  { %658 = dma.done.wait [#allocation12], 512  }
 0x237   :  { %659 = vsyncadd [#allocation12], 4294966784 }
 0x238   :  { %462 = vsyncpa [#allocation3], 1 }
 0x239   :  { %463 = vsyncpa [#allocation6], 1 }
 0x23a   :  { %464 = vsyncpa [#allocation9], 1 }
 0x23b   :  { %465 = vsyncpa [#allocation4], 1 }
 0x23c   :  { %466 = vsyncpa [#allocation12], 1 }

</bundles_post_ra>
